<compile_context>
chip_gen: v7x
topology: tpu7x:2x2x1
jax: 0.10.0
libtpu: 0.0.40
codegen_flags: <defaults>
</compile_context>

<pallas_src>
import functools

import jax
import jax.numpy as jnp
from jax.experimental import pallas as pl
from jax.experimental.pallas import tpu as pltpu


# ----------------------------- helpers --------------------------------------

def _pick_tile(hw: int, max_tile: int = 2048) -> int:
    """Largest multiple of 128 that divides hw and is <= max_tile; else hw."""
    best = None
    for t in range(128, max_tile + 1, 128):
        if t <= hw and hw % t == 0:
            best = t
    return best if best is not None else hw


def _attn_from_pooled(pooled, w1_ref, b1_ref, w2_ref, b2_ref):
    """pooled: (1, C) f32 -> sigmoid(W2 @ relu(W1 @ pooled + b1) + b2): (C,) f32."""
    h = jnp.sum(w1_ref[...] * pooled, axis=-1) + b1_ref[0, :]       # (Cr,)
    h = jnp.maximum(h, 0.0)                                         # ReLU
    y = jnp.sum(w2_ref[...] * h[None, :], axis=-1) + b2_ref[0, :]   # (C,)
    return jax.nn.sigmoid(y)


# ------------------------ fused single-pass kernel ---------------------------

def _ca_fused_kernel(x_ref, w1_ref, b1_ref, w2_ref, b2_ref, o_ref, *, inv_hw):
    # x_ref/o_ref: (1, C, HW)  w1: (Cr, C)  b1: (1, Cr)  w2: (C, Cr)  b2: (1, C)
    xf = x_ref[...].astype(jnp.float32)                 # (1, C, HW)
    pooled = jnp.sum(xf, axis=-1) * inv_hw              # (1, C)  AdaptiveAvgPool2d(1)
    y = _attn_from_pooled(pooled, w1_ref, b1_ref, w2_ref, b2_ref)   # (C,)
    o_ref[...] = (xf * y[None, :, None]).astype(o_ref.dtype)


# ------------------------- two-pass fallback kernels --------------------------

def _ca_attn_kernel(x_ref, w1_ref, b1_ref, w2_ref, b2_ref, y_ref, acc_ref,
                    *, inv_hw):
    # x_ref: (1, C, tile)  y_ref: (1, C)  acc_ref: (1, C) f32 scratch
    t = pl.program_id(1)

    @pl.when(t == 0)
    def _():
        acc_ref[...] = jnp.zeros_like(acc_ref)

    acc_ref[...] += jnp.sum(x_ref[...].astype(jnp.float32), axis=-1)

    @pl.when(t == pl.num_programs(1) - 1)
    def _():
        pooled = acc_ref[...] * inv_hw                  # (1, C)
        y = _attn_from_pooled(pooled, w1_ref, b1_ref, w2_ref, b2_ref)
        y_ref[...] = y[None, :]                         # (1, C)


def _ca_scale_kernel(x_ref, y_ref, o_ref):
    # x_ref: (1, C, tile)  y_ref: (1, C)  o_ref: (1, C, tile)
    xf = x_ref[...].astype(jnp.float32)
    o_ref[...] = (xf * y_ref[...][:, :, None]).astype(o_ref.dtype)


# --------------------------------- wrapper -----------------------------------

_VMEM_CAP = 64 * (1 << 20)          # safe on v7x (64 MiB physical VMEM)


def ca_layer(x, w1, b1, w2, b2, *, max_tile=2048, max_fused_vmem=40 << 20):
    """CALayer forward.  x: (N, C, H, W); w1: (Cr, C); b1: (Cr,); w2: (C, Cr); b2: (C,)."""
    N, C, H, W = x.shape
    Cr = w1.shape[0]
    HW = H * W

    x_flat = x.reshape(N, C, HW)                        # lane-dense last axis
    w1_f = w1.astype(jnp.float32)
    w2_f = w2.astype(jnp.float32)
    b1_2d = b1.reshape(1, Cr).astype(jnp.float32)
    b2_2d = b2.reshape(1, C).astype(jnp.float32)

    dtype_bytes = jnp.dtype(x.dtype).itemsize
    img_bytes = C * HW * dtype_bytes

    # Fused-path VMEM need: double-buffered in + out blocks, f32 intermediates,
    # headroom for params/regalloc.
    fused_need = 4 * img_bytes + 2 * C * HW * 4 + (2 << 20)

    if fused_need <= min(max_fused_vmem, _VMEM_CAP):
        # ---- Single fused pass: pool + FCs + sigmoid + rescale per image ----
        vmem_limit = int(min(_VMEM_CAP, max(32 * (1 << 20), fused_need)))
        out_flat = pl.pallas_call(
            functools.partial(_ca_fused_kernel, inv_hw=1.0 / HW),
            out_shape=jax.ShapeDtypeStruct((N, C, HW), x.dtype),
            grid_spec=pltpu.PrefetchScalarGridSpec(
                num_scalar_prefetch=0,
                grid=(N,),
                in_specs=[
                    pl.BlockSpec((1, C, HW), lambda n: (n, 0, 0)),
                    pl.BlockSpec((Cr, C), lambda n: (0, 0)),
                    pl.BlockSpec((1, Cr), lambda n: (0, 0)),
                    pl.BlockSpec((C, Cr), lambda n: (0, 0)),
                    pl.BlockSpec((1, C), lambda n: (0, 0)),
                ],
                out_specs=pl.BlockSpec((1, C, HW), lambda n: (n, 0, 0)),
            ),
            compiler_params=pltpu.CompilerParams(
                dimension_semantics=("parallel",),
                vmem_limit_bytes=vmem_limit),
            cost_estimate=pl.CostEstimate(
                flops=3 * N * C * HW + 4 * N * C * Cr,
                transcendentals=N * C,
                bytes_accessed=2 * N * C * HW * dtype_bytes),
        )(x_flat, w1_f, b1_2d, w2_f, b2_2d)
        return out_flat.reshape(N, C, H, W)

    # ---- Fallback: two lane-dense tiled passes (large images) ----
    tile = _pick_tile(HW, max_tile)
    T = HW // tile
    blk_bytes = C * tile * dtype_bytes
    vmem_limit = int(min(_VMEM_CAP,
                         max(32 * (1 << 20), 6 * blk_bytes + (2 << 20))))

    # Pass 1: global average pool + 1x1 convs + ReLU + sigmoid -> (N, C)
    attn = pl.pallas_call(
        functools.partial(_ca_attn_kernel, inv_hw=1.0 / HW),
        out_shape=jax.ShapeDtypeStruct((N, C), jnp.float32),
        grid_spec=pltpu.PrefetchScalarGridSpec(
            num_scalar_prefetch=0,
            grid=(N, T),
            in_specs=[
                pl.BlockSpec((1, C, tile), lambda n, t: (n, 0, t)),
                pl.BlockSpec((Cr, C), lambda n, t: (0, 0)),
                pl.BlockSpec((1, Cr), lambda n, t: (0, 0)),
                pl.BlockSpec((C, Cr), lambda n, t: (0, 0)),
                pl.BlockSpec((1, C), lambda n, t: (0, 0)),
            ],
            out_specs=pl.BlockSpec((1, C), lambda n, t: (n, 0)),
            scratch_shapes=[pltpu.VMEM((1, C), jnp.float32)],
        ),
        compiler_params=pltpu.CompilerParams(
            dimension_semantics=("parallel", "arbitrary"),
            vmem_limit_bytes=vmem_limit),
        cost_estimate=pl.CostEstimate(
            flops=2 * N * C * HW,
            transcendentals=N * C,
            bytes_accessed=N * C * HW * dtype_bytes + N * C * 4),
    )(x_flat, w1_f, b1_2d, w2_f, b2_2d)

    # Pass 2: tiled, lane-dense channel rescale x * y
    out_flat = pl.pallas_call(
        _ca_scale_kernel,
        out_shape=jax.ShapeDtypeStruct((N, C, HW), x.dtype),
        grid_spec=pltpu.PrefetchScalarGridSpec(
            num_scalar_prefetch=0,
            grid=(N, T),
            in_specs=[
                pl.BlockSpec((1, C, tile), lambda n, t: (n, 0, t)),
                pl.BlockSpec((1, C), lambda n, t: (n, 0)),
            ],
            out_specs=pl.BlockSpec((1, C, tile), lambda n, t: (n, 0, t)),
        ),
        compiler_params=pltpu.CompilerParams(
            dimension_semantics=("parallel", "parallel"),
            vmem_limit_bytes=vmem_limit),
        cost_estimate=pl.CostEstimate(
            flops=N * C * HW,
            transcendentals=0,
            bytes_accessed=2 * N * C * HW * dtype_bytes),
    )(x_flat, attn)

    return out_flat.reshape(N, C, H, W)


def ca_layer_ref(x, w1, b1, w2, b2):
    """Pure-JAX reference matching the PyTorch forward pass."""
    xf = x.astype(jnp.float32)
    pooled = jnp.mean(xf, axis=(2, 3))                                   # (N, C)
    h = jnp.maximum(pooled @ w1.astype(jnp.float32).T + b1, 0.0)         # (N, Cr)
    y = jax.nn.sigmoid(h @ w2.astype(jnp.float32).T + b2)                # (N, C)
    return (xf * y[:, :, None, None]).astype(x.dtype)


if __name__ == "__main__":
    N, C, H, W = 2, 16, 16, 16
    Cr = C // 8

    key = jax.random.PRNGKey(0)
    kx, k1, kb1, k2, kb2 = jax.random.split(key, 5)

    x = jax.random.normal(kx, (N, C, H, W), dtype=jnp.float32)
    # 1x1 conv weights squeezed to 2-D.
    w1 = jax.random.normal(k1, (Cr, C), dtype=jnp.float32) * 0.1
    b1 = jax.random.normal(kb1, (Cr,), dtype=jnp.float32) * 0.1
    w2 = jax.random.normal(k2, (C, Cr), dtype=jnp.float32) * 0.1
    b2 = jax.random.normal(kb2, (C,), dtype=jnp.float32) * 0.1

    ref = ca_layer_ref(x, w1, b1, w2, b2)

    # Default path: fused single-pass kernel (image fits VMEM budget).
    out = jax.block_until_ready(ca_layer(x, w1, b1, w2, b2))
    assert jnp.allclose(out, ref, atol=1e-5, rtol=1e-5), "fused path mismatch"

    # Also exercise the tiled two-pass fallback (forces H*W=256 into 2 tiles).
    out2 = jax.block_until_ready(
        ca_layer(x, w1, b1, w2, b2, max_tile=128, max_fused_vmem=0))
    assert jnp.allclose(out2, ref, atol=1e-5, rtol=1e-5), "tiled path mismatch"

    print("KERNEL_OK")
</pallas_src>

<mosaic_0001>
module attributes {stable_mosaic.version = 11 : i64} {
  func.func @_ca_fused_kernel(%arg0: i32, %arg1: memref<1x16x256xf32, #tpu.memory_space<vmem>>, %arg2: memref<2x16xf32, #tpu.memory_space<vmem>>, %arg3: memref<1x2xf32, #tpu.memory_space<vmem>>, %arg4: memref<16x2xf32, #tpu.memory_space<vmem>>, %arg5: memref<1x16xf32, #tpu.memory_space<vmem>>, %arg6: memref<1x16x256xf32, #tpu.memory_space<vmem>>) attributes {dimension_semantics = [#tpu.dimension_semantics<parallel>], iteration_bounds = array<i64: 2>, scalar_prefetch = 0 : i64, scratch_operands = 0 : i64, tpu.core_type = #tpu.core_type<tc>, window_params = [{transform_indices = @transform_0, window_bounds = array<i64: 1, 16, 256>}, {pipeline_mode = #tpu.pipeline_mode<synchronous>, transform_indices = @transform_1, window_bounds = array<i64: 2, 16>}, {pipeline_mode = #tpu.pipeline_mode<synchronous>, transform_indices = @transform_2, window_bounds = array<i64: 1, 2>}, {pipeline_mode = #tpu.pipeline_mode<synchronous>, transform_indices = @transform_3, window_bounds = array<i64: 16, 2>}, {pipeline_mode = #tpu.pipeline_mode<synchronous>, transform_indices = @transform_4, window_bounds = array<i64: 1, 16>}, {transform_indices = @transform_5, window_bounds = array<i64: 1, 16, 256>}]} {
    %c0 = arith.constant 0 : index
    %c0_0 = arith.constant 0 : index
    %c0_1 = arith.constant 0 : index
    %0 = vector.load %arg1[%c0, %c0_0, %c0_1] : memref<1x16x256xf32, #tpu.memory_space<vmem>>, vector<1x16x256xf32>
    %cst = arith.constant dense<0.000000e+00> : vector<1x16xf32>
    %1 = vector.multi_reduction <add>, %0, %cst [2] : vector<1x16x256xf32> to vector<1x16xf32>
    %cst_2 = arith.constant 3.906250e-03 : f32
    %2 = vector.broadcast %cst_2 : f32 to vector<1x16xf32>
    %3 = arith.mulf %1, %2 : vector<1x16xf32>
    %c0_3 = arith.constant 0 : index
    %c0_4 = arith.constant 0 : index
    %4 = vector.load %arg2[%c0_3, %c0_4] : memref<2x16xf32, #tpu.memory_space<vmem>>, vector<2x16xf32>
    %5 = vector.broadcast %3 : vector<1x16xf32> to vector<2x16xf32>
    %6 = arith.mulf %4, %5 : vector<2x16xf32>
    %cst_5 = arith.constant dense<0.000000e+00> : vector<2xf32>
    %7 = vector.multi_reduction <add>, %6, %cst_5 [1] : vector<2x16xf32> to vector<2xf32>
    %c0_6 = arith.constant 0 : index
    %c0_7 = arith.constant 0 : index
    %8 = vector.load %arg3[%c0_6, %c0_7] : memref<1x2xf32, #tpu.memory_space<vmem>>, vector<1x2xf32>
    %9 = vector.shape_cast %8 : vector<1x2xf32> to vector<2xf32>
    %10 = arith.addf %7, %9 : vector<2xf32>
    %cst_8 = arith.constant 0.000000e+00 : f32
    %11 = vector.broadcast %cst_8 : f32 to vector<2xf32>
    %12 = arith.maximumf %10, %11 : vector<2xf32>
    %c0_9 = arith.constant 0 : index
    %c0_10 = arith.constant 0 : index
    %13 = vector.load %arg4[%c0_9, %c0_10] : memref<16x2xf32, #tpu.memory_space<vmem>>, vector<16x2xf32>
    %14 = vector.shape_cast %12 : vector<2xf32> to vector<1x2xf32>
    %15 = vector.broadcast %14 : vector<1x2xf32> to vector<16x2xf32>
    %16 = arith.mulf %13, %15 : vector<16x2xf32>
    %cst_11 = arith.constant dense<0.000000e+00> : vector<16xf32>
    %17 = vector.multi_reduction <add>, %16, %cst_11 [1] : vector<16x2xf32> to vector<16xf32>
    %c0_12 = arith.constant 0 : index
    %c0_13 = arith.constant 0 : index
    %18 = vector.load %arg5[%c0_12, %c0_13] : memref<1x16xf32, #tpu.memory_space<vmem>>, vector<1x16xf32>
    %19 = vector.shape_cast %18 : vector<1x16xf32> to vector<16xf32>
    %20 = arith.addf %17, %19 : vector<16xf32>
    %21 = arith.negf %20 : vector<16xf32>
    %22 = math.exp %21 : vector<16xf32>
    %cst_14 = arith.constant 1.000000e+00 : f32
    %23 = vector.broadcast %cst_14 : f32 to vector<16xf32>
    %24 = arith.addf %23, %22 : vector<16xf32>
    %25 = arith.divf %23, %24 : vector<16xf32>
    %26 = vector.shape_cast %25 : vector<16xf32> to vector<1x16x1xf32>
    %27 = vector.broadcast %26 : vector<1x16x1xf32> to vector<1x16x256xf32>
    %28 = arith.mulf %0, %27 : vector<1x16x256xf32>
    %c0_15 = arith.constant 0 : index
    %c0_16 = arith.constant 0 : index
    %c0_17 = arith.constant 0 : index
    %29 = vector.load %arg6[%c0_15, %c0_16, %c0_17] : memref<1x16x256xf32, #tpu.memory_space<vmem>>, vector<1x16x256xf32>
    tpu.vector_store %arg6[%c0_15, %c0_16, %c0_17], %28 {strides = array<i32>} : memref<1x16x256xf32, #tpu.memory_space<vmem>>, vector<1x16x256xf32>,
    return
  }
  func.func @transform_0(%arg0: i32) -> (i32, i32, i32) {
    %c0_i32 = arith.constant 0 : i32
    %c0_i32_0 = arith.constant 0 : i32
    %c0_i32_1 = arith.constant 0 : i32
    return %arg0, %c0_i32, %c0_i32_0 : i32, i32, i32
  }
  func.func @transform_1(%arg0: i32) -> (i32, i32) {
    %c0_i32 = arith.constant 0 : i32
    %c0_i32_0 = arith.constant 0 : i32
    %c0_i32_1 = arith.constant 0 : i32
    return %c0_i32, %c0_i32_0 : i32, i32
  }
  func.func @transform_2(%arg0: i32) -> (i32, i32) {
    %c0_i32 = arith.constant 0 : i32
    %c0_i32_0 = arith.constant 0 : i32
    %c0_i32_1 = arith.constant 0 : i32
    return %c0_i32, %c0_i32_0 : i32, i32
  }
  func.func @transform_3(%arg0: i32) -> (i32, i32) {
    %c0_i32 = arith.constant 0 : i32
    %c0_i32_0 = arith.constant 0 : i32
    %c0_i32_1 = arith.constant 0 : i32
    return %c0_i32, %c0_i32_0 : i32, i32
  }
  func.func @transform_4(%arg0: i32) -> (i32, i32) {
    %c0_i32 = arith.constant 0 : i32
    %c0_i32_0 = arith.constant 0 : i32
    %c0_i32_1 = arith.constant 0 : i32
    return %c0_i32, %c0_i32_0 : i32, i32
  }
  func.func @transform_5(%arg0: i32) -> (i32, i32, i32) {
    %c0_i32 = arith.constant 0 : i32
    %c0_i32_0 = arith.constant 0 : i32
    %c0_i32_1 = arith.constant 0 : i32
    return %arg0, %c0_i32, %c0_i32_0 : i32, i32, i32
  }
}

</mosaic_0001>

<bundles_post_ra>
// kernel: tpu_custom_call.1
= control target key start
LH: loop header
LB: loop body
LE: loop exit
PB: predicated region body
PF: predicated region fallthrough
CT: control target
= control target key end

     0   :  { %10 = vsyncpa [#allocation3], 0  ;;  %s868_s0 = inlined_call_operand.hbm [shape: f32[2,16,256], index: 0, kind: input, shape index: {}]   ;;  %s869_s1 = inlined_call_operand.vmem [shape: f32[2,16], index: 1, kind: input, shape index: {}]   ;;  %s870_s2 = inlined_call_operand.vmem [shape: f32[1,2], index: 2, kind: input, shape index: {}]   ;;  %s871_s3 = inlined_call_operand.vmem [shape: f32[16,2], index: 3, kind: input, shape index: {}]   ;;  %s872_s4 = inlined_call_operand.vmem [shape: f32[1,16], index: 4, kind: input, shape index: {}]   ;;  %s873_s5 = inlined_call_operand.hbm [shape: f32[2,16,256], index: 5, kind: output, shape index: {}]  }
   0x1   :  { %12 = vsyncpa [#allocation3 + $0x1], 0 }
   0x2   :  { %13 = vsyncpa [#allocation4], 0 }
   0x3   :  { %15 = vsyncpa [#allocation4 + $0x1], 0  ;;  %s671_s18 = smov 0   ;;  %s673_s19 = smov 0  }
   0x4   :  { %s675_s20 = smov 0   ;;  %s677_s21 = smov 0  }
   0x5 LB: > { %s692_s22 = sadd.s32 4294967295, %s632_s21   ;;  %s455_s23 = sadd.s32 4294967294, %s632_s21   ;;  %s632_s21 = sphi %s677_s21, %s886_s21   ;;  %s628_s20 = sphi %s675_s20, %s885_s20   ;;  %s624_s19 = sphi %s673_s19, %s884_s19   ;;  %s620_s18 = sphi %s671_s18, %s883_s18  }
   0x6   : > { %s696_s24 = sadd.s32 1, %s632_s21   ;;  %s28_s25 = sadd.s32 1, %s628_s20 }
   0x7   : > { %s25_s26 = ssub.s32 %s632_s21, %s696_s24  ;;  %p35_p0 = scmp.ne.s32.totalorder %s628_s20, %s624_s19 }
   0x8   : > { %p26_p1 = scmp.eq.s32.totalorder %s25_s26, 0  ;;  %p36_p2 = scmp.eq.s32.totalorder %s632_s21, 0 }
   0x9   : > { %p41_p3 = scmp.ne.s32.totalorder %s624_s19, %s620_s18  ;;  %p42_p4 = scmp.eq.s32.totalorder %s692_s22, 0 }
   0xa   : > { %s708_s27 = scalar_select %p26_p1, %s628_s20, %s28_s25  }
   0xb   : > { %p710_p5 = por %p36_p2, %p35_p0  ;;  %p714_p6 = por %p42_p4, %p41_p3 }
   0xc   : > { %p149_p7 = scmp.eq.s32.totalorder %s692_s22, 1  ;;  %p155_p8 = scmp.eq.s32.totalorder %s455_s23, 1 }
   0xd   : > { %p487_p10 = scmp.lt.s32.totalorder %s632_s21, 2  ;;  %s187_s7 = sand.u32 1, %s628_s20  }
   0xe   : > { %p721_p11 = por %p149_p7, %p35_p0  ;;  %p725_p12 = por %p155_p8, %p41_p3 }
   0xf   : > { %s473_s8 = sshll.u32 %s632_s21, 9  ;;  %s458_s9 = sshll.u32 %s187_s7, 5 }
  0x10   : > { %s877_s30 = scalar_select %p721_p11, 1, 0 }
  0x11   : > { %s878_s6 = scalar_select %p725_p12, 1, 0 }
  0x12   : > { %s734_s12 = scalar_lea.hbm %s868_s0, %s473_s8  ;;  %s191_s13 = scalar_lea.vmem [#allocation2], %s458_s9 }
  0x13   : > { %s198_s14 = sshll.u32 %s191_s13, 4  ;;  %p738_p13 = pnand %p487_p10, %p710_p5  ;;  %s742_s14 = int_to_ptr.vmem [resolvable:$true] %s198_s14 }
  0x14   : > { %s744_s16 = scalar_lea.sflag [#allocation3], %s187_s7  ;;  %s536_s17 = scalar_lea.hbm %s734_s12, 512 }
  0x15   : > { %p537_p0 = scmp.ne.s32.totalorder %s734_s12, %s536_s17  ;;  %p538_p1 = pneg %p738_p13 }
  0x16   : > { %s541_s26 = scalar_lea.hbm %s868_s0, 1024  ;;  %p542_p4 = scmp.lt.u32.totalorder %s734_s12, %s868_s0 }
  0x17   : > { %p539_p2 = pnand %p538_p1, %p537_p0  ;;  %p543_p5 = scmp.lt.u32.totalorder %s541_s26, %s536_s17 }
  0x18   : > { %p545_p8 = scmp.lt.u32.totalorder %s536_s17, %s734_s12 }
  0x19   : > { %p540_p3 = pneg %p539_p2  ;;  %p544_p7 = por %p543_p5, %p542_p4 }
  0x1b   : > { %p546_p10 = por %p545_p8, %p544_p7 }
  0x1d   : > { %p547_p9 = pnand %p546_p10, %p540_p3 }
  0x1f   : > { %550 = shalt.err (!%p547_p9)
}
  0x20   : > { %s551_s7 = scalar_lea.vmem %s742_s14, 512  ;;  %s634_s9 = smov [#allocation2]  }
  0x21   : > { %p552_p0 = scmp.ne.s32.totalorder %s742_s14, %s551_s7  ;;  %s556_s10 = sshll.u32 %s634_s9, 4  ;;  %s557_s10 = int_to_ptr.vmem [resolvable:$false] %s556_s10 }
  0x22   : > { %s558_s11 = scalar_lea.vmem %s557_s10, 1024  ;;  %p559_p11 = scmp.lt.s32.totalorder %s742_s14, %s557_s10 }
  0x23   : > { %p554_p2 = pnand %p552_p0, %p538_p1  ;;  %p560_p4 = scmp.lt.s32.totalorder %s558_s11, %s551_s7 }
  0x25   : > { %p555_p12 = pneg %p554_p2  ;;  %p561_p5 = por %p560_p4, %p559_p11 }
  0x27   : > { %p562_p7 = pnand %p561_p5, %p555_p12 }
  0x29   : > { %565 = shalt.err (!%p562_p7)
}
  0x2a   : > { %s635_s13 = smov 256   ;;  %s636_s17 = smov 16  }
  0x2b   : > { %482 = dma.hbm_to_vmem [thread:$0]  (!%p738_p13), %s734_s12, 512, %s742_s14, %s744_s16, %s635_s13, %s635_s13, %s636_s17  }
  0x2c   : > { %p461_p9 = scmp.ge.s32.totalorder %s632_s21, 1  ;;  %p206_p1 = scmp.lt.s32.totalorder %s632_s21, 3 }
  0x2e   : > { %p207_p3 = pnand %p461_p9, %p206_p1 }
  0x2f   : > { %s775_s23 = sand.u32 (!%p207_p3), 1, %s624_s19  }
  0x30   : > { %210 = sbr.rel (%p207_p3) target bundleno = 819 (0x333), region = 40  ;;  %s462_s25 = sshll.u32 (!%p207_p3), %s775_s23, 5 }
  0x31   : > { %s213_s26 = scalar_lea.sflag (!%p207_p3), [#allocation3], %s775_s23  ;;  %s216_s28 = scalar_lea.vmem (!%p207_p3), [#allocation2], %s462_s25 }
  0x37   : > { %611 = dma.done.wait (%p714_p6), %s213_s26, 512  }
  0x38   : > { %613 = vsyncadd (%p714_p6), %s213_s26, 4294966784  ;;  %v785_v0 = vld [vmem:[%s216_s28] sm:$0xff]  ;;  %v787_v1 = vld [vmem:[%s216_s28 + $0x8] sm:$0xff]  ;;  %v258_v6 = vlaneseq  ;;  %vm269_vm0 = vcmask 130112   ;;  %vm273_vm1 = vcmask 123904   ;;  %v637_v23 = vmov 0  }
  0x39   : > { %v789_v2 = vld [vmem:[%s216_s28 + $0x10] sm:$0xff]  ;;  %v247_v3 = vadd.f32 %v787_v1, %v785_v0  ;;  %v793_v4 = vld [vmem:[%s216_s28 + $0x18] sm:$0xff]  ;;  %v255_v18 = vld [vmem:[%s869_s1] sm:$0x3]  ;;  %526 = vset.pattern.permute.xlu0 %v637_v23  ;;  %527 = vset.pattern.permute.xlu1 %v637_v23  ;;  %vm314_vm2 = vcmask 15360   ;;  %s242_s13 = scalar_lea.vmem [#allocation5], %s462_s25 }
  0x3a   : > { %v250_v5 = vadd.f32 %v793_v4, %v789_v2  ;;  %v259_v7 = vand.u32 127, %v258_v6  ;;  %v261_v8 = vshrl.u32 %v258_v6, 7  ;;  %v464_v22 = vld [vmem:[%s870_s2] ss:$0 sm:$0xff]  ;;  %v290_v29 = vld [vmem:[%s871_s3 + $0x8] sm:$0xff]  ;;  %s382_s17 = sshll.u32 %s242_s13, 4  ;;  %s817_s17 = int_to_ptr.vmem [resolvable:$true] %s382_s17 }
  0x3b   : > { %248 = vadd.xlane.f32.xlu0 %v247_v3  ;;  %v289_v30 = vld [vmem:[%s871_s3] sm:$0xff]  ;;  %s474_s26 = sshll.u32 %s692_s22, 9  ;;  %s369_s22 = scalar_lea.sflag [#allocation4], %s775_s23 }
  0x3c   : > { %v264_v9 = vadd.s32 4294967288, %v259_v7  ;;  %v262_v11 = vsub.s32 %v259_v7, %v261_v8  ;;  %v465_v36 = vld [vmem:[%s872_s4] ss:$0 sm:$0xff]  ;;  %s822_s25 = scalar_lea.hbm %s873_s5, %s474_s26  ;;  %s566_s12 = scalar_lea.vmem %s817_s17, 512 }
  0x3d   : > { %p567_p6 = scmp.ne.s32.totalorder %s817_s17, %s566_s12  ;;  %p880_p11 = scmp.ne.s32.totalorder %s877_s30, 0 }
  0x3e   : > { %v267_v13 = vsub.s32 %v264_v9, %v261_v8  ;;  %s638_s14 = smov [#allocation5]  }
  0x3f   : > { %251 = vadd.xlane.f32.xlu0 %v250_v5  ;;  %p568_p12 = pnand %p567_p6, %p880_p11  ;;  %s570_s15 = sshll.u32 %s638_s14, 4  ;;  %s571_s15 = int_to_ptr.vmem [resolvable:$false] %s570_s15 }
  0x40   : > { %s572_s16 = scalar_lea.vmem %s571_s15, 1024  ;;  %p573_p8 = scmp.lt.s32.totalorder %s817_s17, %s571_s15 }
  0x41   : > { %p569_p13 = pneg %p568_p12  ;;  %p574_p10 = scmp.lt.s32.totalorder %s572_s16, %s566_s12 }
  0x43   : > { %p575_p0 = por %p574_p10, %p573_p8 }
  0x45   : > { %p576_p2 = pnand %p575_p0, %p569_p13 }
  0xc8   : > { %v249_v10 = vpop.xlane.xlu0 %248 }
  0xc9   : > { %v253_v12 = vmul.f32 0.00390625, %v249_v10 }
  0xcb   : > { %v263_v16 = vrot.slane %v253_v12, %v262_v11 }
  0xcc   : > { %v252_v14 = vpop.xlane.xlu0 %251 }
  0xcd   : > { %v254_v15 = vmul.f32 0.00390625, %v252_v14 }
  0xcf   : > { %v268_v17 = vrot.slane %v254_v15, %v267_v13 }
  0xd1   : > { %v270_v19 = vsel %vm269_vm0, %v268_v17, %v263_v16 }
  0xd2   : > { %v272_v20 = vmul.f32 %v270_v19, %v255_v18 }
  0xd4   : > { %v274_v21 = vsel %vm273_vm1, %v272_v20, 0.0 }
  0xd5   : > { %275 = vadd.xlane.f32.xlu1 %v274_v21 }
  0xe6   : > { %284 = vbcast.lane.b32.xlu1 %v464_v22, 256 }
 0x162   : > { %v276_v24 = vpop.xlane.xlu1 %275 }
 0x166   : > { %v285_v25 = vpop.permute.xlu1 %284 }
 0x167   : > { %v287_v26 = vadd.f32 %v285_v25, %v276_v24 }
 0x169   : > { %v288_v27 = vmax.f32 %v287_v26, 0.0 }
 0x16b   : > { %293 = vperm.xlu0 %526, %v288_v27  }
 0x1ea   : > { %v294_v28 = vpop.permute.xlu0 %293 }
 0x1eb   : > { %v298_v31 = vrot.slane %v294_v28, %v262_v11 }
 0x1ed   : > { %v313_v32 = vmul.f32 %v298_v31, %v290_v29  ;;  %v312_v33 = vmul.f32 %v298_v31, %v289_v30 }
 0x1ef   : > { %v318_v34 = vsel %vm314_vm2, %v313_v32, 0.0  ;;  %v315_v35 = vsel %vm314_vm2, %v312_v33, 0.0 }
 0x1f0   : > { %319 = vadd.xlane.f32.xlu0 %v318_v34  ;;  %316 = vadd.xlane.f32.xlu1 %v315_v35 }
 0x201   : > { %328 = vbcast.lane.b32.xlu1 %v465_v36, 256 }
 0x205   : > { %332 = vbcast.lane.b32.xlu1 %v465_v36, 264 }
 0x27d   : > { %v317_v37 = vpop.xlane.xlu1 %316  ;;  %v320_v41 = vpop.xlane.xlu0 %319 }
 0x281   : > { %v329_v38 = vpop.permute.xlu1 %328 }
 0x282   : > { %v336_v39 = vadd.f32 %v329_v38, %v317_v37 }
 0x284   : > { %v466_v40 = vmul.f32 -1.442695, %v336_v39 }
 0x285   : > { %v333_v42 = vpop.permute.xlu1 %332 }
 0x286   : > { %528 = vpow2.f32 %v466_v40  ;;  %v337_v43 = vadd.f32 %v333_v42, %v320_v41 }
 0x288   : > { %v467_v44 = vmul.f32 -1.442695, %v337_v43 }
 0x28a   : > { %530 = vpow2.f32 %v467_v44 }
 0x290   : > { %v529_v45 = vpop.eup %528 }
 0x291   : > { %v344_v46 = vadd.f32 1.0, %v529_v45 }
 0x293   : > { %532 = vrcp.f32 %v344_v46 }
 0x294   : > { %v531_v47 = vpop.eup %530 }
 0x295   : > { %v345_v48 = vadd.f32 1.0, %v531_v47 }
 0x297   : > { %534 = vrcp.f32 %v345_v48 }
 0x29d   : > { %v533_v49 = vpop.eup %532 }
 0x29e   : > { %352 = vperm.xlu1 %527, %v533_v49  }
 0x2a1   : > { %v535_v50 = vpop.eup %534 }
 0x2a2   : > { %357 = vperm.xlu1 %527, %v535_v50  }
 0x31d   : > { %v353_v51 = vpop.permute.xlu1 %352 }
 0x31e   : > { %v360_v52 = vmul.f32 %v353_v51, %v785_v0  ;;  %v361_v53 = vmul.f32 %v353_v51, %v787_v1 }
 0x320   : > { %364 = vst [vmem:[%s242_s13] sm:$0xff] %v360_v52  ;;  %365 = vst [vmem:[%s242_s13 + $0x8] sm:$0xff] %v361_v53 }
 0x321   : > { %v358_v54 = vpop.permute.xlu1 %357 }
 0x322   : > { %v362_v55 = vmul.f32 %v358_v54, %v789_v2  ;;  %v363_v56 = vmul.f32 %v358_v54, %v793_v4 }
 0x324   : > { %366 = vst [vmem:[%s242_s13 + $0x10] sm:$0xff] %v362_v55  ;;  %367 = vst [vmem:[%s242_s13 + $0x18] sm:$0xff] %v363_v56 }
 0x325   : > { %579 = shalt.err (!%p576_p2)
}
 0x326   : > { %s580_s8 = scalar_lea.hbm %s822_s25, 512  ;;  %s584_s10 = scalar_lea.hbm %s873_s5, 1024 }
 0x327   : > { %p581_p4 = scmp.ne.s32.totalorder %s822_s25, %s580_s8  ;;  %p585_p9 = scmp.lt.u32.totalorder %s822_s25, %s873_s5 }
 0x328   : > { %p586_p1 = scmp.lt.u32.totalorder %s584_s10, %s580_s8  ;;  %p588_p6 = scmp.lt.u32.totalorder %s580_s8, %s822_s25 }
 0x329   : > { %p582_p5 = pnand %p581_p4, %p880_p11 }
 0x32a   : > { %p587_p3 = por %p586_p1, %p585_p9 }
 0x32b   : > { %p583_p7 = pneg %p582_p5 }
 0x32c   : > { %p589_p12 = por %p588_p6, %p587_p3 }
 0x32e   : > { %p590_p13 = pnand %p589_p12, %p583_p7 }
 0x330   : > { %593 = shalt.err (!%p590_p13)
}
 0x331   : > { %s639_s26 = smov 256   ;;  %s640_s28 = smov 16  }
 0x332   : > { %477 = dma.vmem_to_hbm [thread:$0]  (%p880_p11), %s817_s17, 512, %s822_s25, %s369_s22, %s639_s26, %s639_s26, %s640_s28  }
 0x333 PF: > { %s397_s29 = sand.u32 1, %s620_s18   ;;  %p881_p8 = scmp.ne.s32.totalorder %s878_s6, 0 }
 0x334   : > { %p882_p10 = scmp.ge.s32.totalorder %s632_s21, 2  ;;  %s398_s12 = scalar_lea.sflag [#allocation4], %s397_s29 }
 0x336   : > { %p484_p0 = pnand %p882_p10, %p881_p8 }
 0x338   : > { %615 = dma.done.wait (!%p484_p0), %s398_s12, 512  }
 0x339   : > { %617 = vsyncadd (!%p484_p0), %s398_s12, 4294966784  ;;  %p18_p2 = scmp.ge.s32.totalorder %s696_s24, 4   ;;  %s883_s18 = smov %s624_s19 }
 0x33a   : > { %s884_s19 = smov %s628_s20  ;;  %s885_s20 = smov %s708_s27 }
 0x33b   : > { %s886_s21 = smov %s696_s24  ;;  %20 = sbr.rel (!%p18_p2) target bundleno = 5 (0x5), region = 85 }
 0x342   :  { %403 = vsyncpa [#allocation3], 1 }
 0x343   :  { %405 = vsyncpa [#allocation3 + $0x1], 1 }
 0x344   :  { %406 = vsyncpa [#allocation4], 1 }
 0x345   :  { %408 = vsyncpa [#allocation4 + $0x1], 1 }

</bundles_post_ra>
